<compile_context>
chip_gen: v7x
topology: tpu7x:2x2x1
jax: 0.10.0
libtpu: 0.0.40
codegen_flags: <defaults>
</compile_context>

<pallas_src>
import functools
import math

import jax
import jax.numpy as jnp
from jax.experimental import pallas as pl
from jax.experimental.pallas import tpu as pltpu

_GELU_C = math.sqrt(2.0 / math.pi)


def _round_up(x, m):
    return (x + m - 1) // m * m


# --------------------------------------------------------------------------
# Kernel: tiled matmul + bias (+ optional tanh-GELU), f32 accumulator
# --------------------------------------------------------------------------
def _linear_kernel(x_ref, w_ref, b_ref, o_ref, acc_ref, *, apply_gelu):
    k = pl.program_id(2)

    @pl.when(k == 0)
    def _init():
        acc_ref[...] = jnp.zeros_like(acc_ref)

    acc_ref[...] += jnp.dot(x_ref[...], w_ref[...],
                            preferred_element_type=jnp.float32)

    @pl.when(k == pl.num_programs(2) - 1)
    def _finalize():
        y = acc_ref[...] + b_ref[...].astype(jnp.float32)
        if apply_gelu:
            # 0.5*x*(1+tanh(sqrt(2/pi)*(x+0.044715*x^3))) in f32 (EUP tanh).
            y = 0.5 * y * (1.0 + jnp.tanh(_GELU_C * (y + 0.044715 * y * y * y)))
        o_ref[...] = y.astype(o_ref.dtype)


def linear(x, w, b, *, apply_gelu=False, out_dtype=jnp.float32,
           tm=256, tn=512, tk=512):
    """y = gelu?(x @ w + b), x:(M,K) w:(K,N) b:(N,) -> (M,N)."""
    m, kdim = x.shape
    _, n = w.shape

    # Tile sizes respecting the (8, 128) layout constraint; pad to multiples.
    tm = min(tm, _round_up(m, 8))
    tn = min(tn, _round_up(n, 128))
    tk = min(tk, _round_up(kdim, 128))
    mp, kp, np_ = _round_up(m, tm), _round_up(kdim, tk), _round_up(n, tn)

    xb = x.astype(jnp.bfloat16)
    wb = w.astype(jnp.bfloat16)
    if (mp, kp) != (m, kdim):
        xb = jnp.pad(xb, ((0, mp - m), (0, kp - kdim)))
    if (kp, np_) != (kdim, n):
        wb = jnp.pad(wb, ((0, kp - kdim), (0, np_ - n)))
    bb = jnp.pad(b.astype(jnp.float32), (0, np_ - n)).reshape(1, np_)

    grid = (mp // tm, np_ // tn, kp // tk)
    out = pl.pallas_call(
        functools.partial(_linear_kernel, apply_gelu=apply_gelu),
        out_shape=jax.ShapeDtypeStruct((mp, np_), out_dtype),
        grid=grid,
        in_specs=[
            pl.BlockSpec((tm, tk), lambda i, j, k: (i, k)),
            pl.BlockSpec((tk, tn), lambda i, j, k: (k, j)),
            pl.BlockSpec((1, tn), lambda i, j, k: (0, j)),
        ],
        out_specs=pl.BlockSpec((tm, tn), lambda i, j, k: (i, j)),
        scratch_shapes=[pltpu.VMEM((tm, tn), jnp.float32)],
        compiler_params=pltpu.CompilerParams(
            dimension_semantics=("parallel", "parallel", "arbitrary"),
            vmem_limit_bytes=48 * 1024 * 1024,  # safe on v7x's 64 MiB VMEM
        ),
    )(xb, wb, bb)

    if (mp, np_) != (m, n):
        out = out[:m, :n]
    return out


# --------------------------------------------------------------------------
# FeedForward module
# --------------------------------------------------------------------------
def init_feed_forward(key, embed_dim):
    k1, k2 = jax.random.split(key)
    hidden = 4 * embed_dim
    return {
        "w1": 0.02 * jax.random.normal(k1, (embed_dim, hidden), jnp.float32),
        "b1": jnp.zeros((hidden,), jnp.float32),
        "w2": 0.02 * jax.random.normal(k2, (hidden, embed_dim), jnp.float32),
        "b2": jnp.zeros((embed_dim,), jnp.float32),
    }


def feed_forward(params, x):
    """FeedForward.forward: Linear -> GELU -> Linear, x: (..., D)."""
    orig_shape = x.shape
    d = orig_shape[-1]
    x2 = x.reshape(-1, d)
    # Linear(D, 4D) + GELU fused in one pallas_call; hidden kept in bf16.
    h = linear(x2, params["w1"], params["b1"], apply_gelu=True,
               out_dtype=jnp.bfloat16)
    # Linear(4D, D)
    y = linear(h, params["w2"], params["b2"], apply_gelu=False,
               out_dtype=jnp.float32)
    return y.reshape(orig_shape)


def feed_forward_ref(params, x):
    """Pure-JAX f32 reference for correctness checking."""
    h = x @ params["w1"] + params["b1"]
    h = 0.5 * h * (1.0 + jnp.tanh(_GELU_C * (h + 0.044715 * h ** 3)))
    return h @ params["w2"] + params["b2"]


# --------------------------------------------------------------------------
if __name__ == "__main__":
    B, T, D = 2, 8, 32  # batch=2, seq=8, embed_dim=32

    key = jax.random.PRNGKey(0)
    pkey, xkey = jax.random.split(key)
    params = init_feed_forward(pkey, D)
    x = jax.random.normal(xkey, (B, T, D), jnp.float32)

    out = feed_forward(params, x)
    out = jax.block_until_ready(out)

    assert out.shape == (B, T, D)
    assert bool(jnp.all(jnp.isfinite(out)))

    # Loose tolerance: matmul inputs are bf16 (MXU), accumulation is f32.
    ref = feed_forward_ref(params, x)
    err = float(jnp.max(jnp.abs(out - ref)) / (jnp.max(jnp.abs(ref)) + 1e-6))
    assert err < 5e-2, f"mismatch vs reference: rel-max-err={err}"

    print("KERNEL_OK")
</pallas_src>

<mosaic_0001>
module attributes {stable_mosaic.version = 11 : i64} {
  func.func @_linear_kernel(%arg0: i32, %arg1: i32, %arg2: i32, %arg3: memref<16x128xbf16, #tpu.memory_space<vmem>>, %arg4: memref<128x128xbf16, #tpu.memory_space<vmem>>, %arg5: memref<1x128xf32, #tpu.memory_space<vmem>>, %arg6: memref<16x128xbf16, #tpu.memory_space<vmem>>, %arg7: memref<16x128xf32, #tpu.memory_space<vmem>>) attributes {dimension_semantics = [#tpu.dimension_semantics<parallel>, #tpu.dimension_semantics<parallel>, #tpu.dimension_semantics<arbitrary>], iteration_bounds = array<i64: 1, 1, 1>, scalar_prefetch = 0 : i64, scratch_operands = 1 : i64, tpu.core_type = #tpu.core_type<tc>, window_params = [{transform_indices = @transform_0, window_bounds = array<i64: 16, 128>}, {transform_indices = @transform_1, window_bounds = array<i64: 128, 128>}, {transform_indices = @transform_2, window_bounds = array<i64: 1, 128>}, {transform_indices = @transform_3, window_bounds = array<i64: 16, 128>}]} {
    %c0_i32 = arith.constant 0 : i32
    %0 = arith.cmpi eq, %arg2, %c0_i32 : i32
    %1 = arith.extui %0 : i1 to i32
    %c0_i32_0 = arith.constant 0 : i32
    %2 = arith.cmpi ne, %1, %c0_i32_0 : i32
    scf.if %2 {
      %cst_10 = arith.constant 0.000000e+00 : f32
      %12 = vector.broadcast %cst_10 : f32 to vector<16x128xf32>
      %c0_11 = arith.constant 0 : index
      %c0_12 = arith.constant 0 : index
      %13 = vector.load %arg7[%c0_11, %c0_12] : memref<16x128xf32, #tpu.memory_space<vmem>>, vector<16x128xf32>
      tpu.vector_store %arg7[%c0_11, %c0_12], %12 {strides = array<i32>} : memref<16x128xf32, #tpu.memory_space<vmem>>, vector<16x128xf32>,
    } else {
    }
    %c0 = arith.constant 0 : index
    %c0_1 = arith.constant 0 : index
    %3 = vector.load %arg7[%c0, %c0_1] : memref<16x128xf32, #tpu.memory_space<vmem>>, vector<16x128xf32>
    %c0_2 = arith.constant 0 : index
    %c0_3 = arith.constant 0 : index
    %4 = vector.load %arg3[%c0_2, %c0_3] : memref<16x128xbf16, #tpu.memory_space<vmem>>, vector<16x128xbf16>
    %c0_4 = arith.constant 0 : index
    %c0_5 = arith.constant 0 : index
    %5 = vector.load %arg4[%c0_4, %c0_5] : memref<128x128xbf16, #tpu.memory_space<vmem>>, vector<128x128xbf16>
    %cst = arith.constant dense<0.000000e+00> : vector<16x128xf32>
    %6 = tpu.matmul %4, %5, %cst {dimension_numbers = #tpu.dot_dimension_numbers<[1], [0], [0], [1], [0, 0, 1, 1], [], []>} : vector<16x128xbf16>, vector<128x128xbf16>, vector<16x128xf32> -> vector<16x128xf32>
    %7 = arith.addf %3, %6 : vector<16x128xf32>
    %c0_6 = arith.constant 0 : index
    %c0_7 = arith.constant 0 : index
    %8 = vector.load %arg7[%c0_6, %c0_7] : memref<16x128xf32, #tpu.memory_space<vmem>>, vector<16x128xf32>
    tpu.vector_store %arg7[%c0_6, %c0_7], %7 {strides = array<i32>} : memref<16x128xf32, #tpu.memory_space<vmem>>, vector<16x128xf32>,
    %c0_i32_8 = arith.constant 0 : i32
    %9 = arith.cmpi eq, %arg2, %c0_i32_8 : i32
    %10 = arith.extui %9 : i1 to i32
    %c0_i32_9 = arith.constant 0 : i32
    %11 = arith.cmpi ne, %10, %c0_i32_9 : i32
    scf.if %11 {
      %c0_10 = arith.constant 0 : index
      %c0_11 = arith.constant 0 : index
      %12 = vector.load %arg7[%c0_10, %c0_11] : memref<16x128xf32, #tpu.memory_space<vmem>>, vector<16x128xf32>
      %c0_12 = arith.constant 0 : index
      %c0_13 = arith.constant 0 : index
      %13 = vector.load %arg5[%c0_12, %c0_13] : memref<1x128xf32, #tpu.memory_space<vmem>>, vector<1x128xf32>
      %14 = vector.broadcast %13 : vector<1x128xf32> to vector<16x128xf32>
      %15 = arith.addf %12, %14 : vector<16x128xf32>
      %cst_14 = arith.constant 5.000000e-01 : f32
      %16 = vector.broadcast %cst_14 : f32 to vector<16x128xf32>
      %17 = arith.mulf %16, %15 : vector<16x128xf32>
      %cst_15 = arith.constant 4.471500e-02 : f32
      %18 = vector.broadcast %cst_15 : f32 to vector<16x128xf32>
      %19 = arith.mulf %18, %15 : vector<16x128xf32>
      %20 = arith.mulf %19, %15 : vector<16x128xf32>
      %21 = arith.mulf %20, %15 : vector<16x128xf32>
      %22 = arith.addf %15, %21 : vector<16x128xf32>
      %cst_16 = arith.constant 0.797884583 : f32
      %23 = vector.broadcast %cst_16 : f32 to vector<16x128xf32>
      %24 = arith.mulf %23, %22 : vector<16x128xf32>
      %25 = math.tanh %24 : vector<16x128xf32>
      %cst_17 = arith.constant 1.000000e+00 : f32
      %26 = vector.broadcast %cst_17 : f32 to vector<16x128xf32>
      %27 = arith.addf %26, %25 : vector<16x128xf32>
      %28 = arith.mulf %17, %27 : vector<16x128xf32>
      %29 = arith.truncf %28 : vector<16x128xf32> to vector<16x128xbf16>
      %c0_18 = arith.constant 0 : index
      %c0_19 = arith.constant 0 : index
      %30 = vector.load %arg6[%c0_18, %c0_19] : memref<16x128xbf16, #tpu.memory_space<vmem>>, vector<16x128xbf16>
      tpu.vector_store %arg6[%c0_18, %c0_19], %29 {strides = array<i32>} : memref<16x128xbf16, #tpu.memory_space<vmem>>, vector<16x128xbf16>,
    } else {
    }
    return
  }
  func.func @transform_0(%arg0: i32, %arg1: i32, %arg2: i32) -> (i32, i32) {
    %c0_i32 = arith.constant 0 : i32
    return %arg0, %arg2 : i32, i32
  }
  func.func @transform_1(%arg0: i32, %arg1: i32, %arg2: i32) -> (i32, i32) {
    %c0_i32 = arith.constant 0 : i32
    return %arg2, %arg1 : i32, i32
  }
  func.func @transform_2(%arg0: i32, %arg1: i32, %arg2: i32) -> (i32, i32) {
    %c0_i32 = arith.constant 0 : i32
    %c0_i32_0 = arith.constant 0 : i32
    return %c0_i32, %arg1 : i32, i32
  }
  func.func @transform_3(%arg0: i32, %arg1: i32, %arg2: i32) -> (i32, i32) {
    %c0_i32 = arith.constant 0 : i32
    return %arg0, %arg1 : i32, i32
  }
}

</mosaic_0001>

<bundles_post_ra>
// kernel: tpu_custom_call.1
= control target key start
LH: loop header
LB: loop body
LE: loop exit
PB: predicated region body
PF: predicated region fallthrough
CT: control target
= control target key end

     0   :  { %8 = vsyncpa [#allocation4], 0  ;;  %s444_s0 = inlined_call_operand.hbm [shape: bf16[16,128], index: 0, kind: input, shape index: {}]   ;;  %s445_s1 = inlined_call_operand.hbm [shape: bf16[128,128], index: 1, kind: input, shape index: {}]   ;;  %s446_s2 = inlined_call_operand.vmem [shape: f32[1,128], index: 2, kind: input, shape index: {}]   ;;  %s447_s3 = inlined_call_operand.hbm [shape: bf16[16,128], index: 3, kind: output, shape index: {}]  }
   0x1   :  { %9 = vsyncpa [#allocation7], 0 }
   0x2   :  { %10 = vsyncpa [#allocation5], 0  ;;  %s369_s12 = smov [#allocation3]   ;;  %s297_s16 = scalar_lea.hbm %s444_s0, 128 }
   0x3   :  { %s16_s13 = sshll.u32 %s369_s12, 4  ;;  %p298_p0 = scmp.ne.s32.totalorder %s444_s0, %s297_s16  ;;  %s17_s13 = int_to_ptr.vmem [resolvable:$true] %s16_s13 }
   0x4   :  { %p301_p1 = scmp.lt.u32.totalorder %s297_s16, %s444_s0 }
   0x6   :  { %p303_p2 = pnand %p301_p1, %p298_p0 }
   0x8   :  { %306 = shalt.err (!%p303_p2)
}
   0x9   :  { %s307_s21 = scalar_lea.vmem %s17_s13, 128  ;;  %p312_p4 = scmp.lt.s32.totalorder %s17_s13, %s17_s13 }
   0xa   :  { %p308_p3 = scmp.ne.s32.totalorder %s17_s13, %s307_s21  ;;  %p313_p5 = scmp.lt.s32.totalorder %s307_s21, %s307_s21 }
   0xc   :  { %p314_p6 = por %p313_p5, %p312_p4 }
   0xe   :  { %p315_p7 = pnand %p314_p6, %p308_p3 }
  0x10   :  { %318 = shalt.err (!%p315_p7)
}
  0x11   :  { %s370_s22 = smov 64   ;;  %s371_s23 = smov 4  }
  0x12   :  { %22 = dma.hbm_to_vmem [thread:$0]  %s444_s0, 128, %s17_s13, [#allocation4], %s370_s22, %s370_s22, %s371_s23  }
  0x13   :  { %s372_s26 = smov [#allocation6]   ;;  %s319_s30 = scalar_lea.hbm %s445_s1, 1024 }
  0x14   :  { %s28_s27 = sshll.u32 %s372_s26, 4  ;;  %p320_p8 = scmp.ne.s32.totalorder %s445_s1, %s319_s30  ;;  %s29_s27 = int_to_ptr.vmem [resolvable:$true] %s28_s27 }
  0x15   :  { %p323_p9 = scmp.lt.u32.totalorder %s319_s30, %s445_s1 }
  0x17   :  { %p325_p10 = pnand %p323_p9, %p320_p8 }
  0x19   :  { %328 = shalt.err (!%p325_p10)
}
  0x1a   :  { %s329_s8 = scalar_lea.vmem %s29_s27, 1024  ;;  %p334_p12 = scmp.lt.s32.totalorder %s29_s27, %s29_s27 }
  0x1b   :  { %p330_p11 = scmp.ne.s32.totalorder %s29_s27, %s329_s8  ;;  %p335_p13 = scmp.lt.s32.totalorder %s329_s8, %s329_s8 }
  0x1d   :  { %p336_p0 = por %p335_p13, %p334_p12 }
  0x1f   :  { %p337_p1 = pnand %p336_p0, %p330_p11 }
  0x21   :  { %340 = shalt.err (!%p337_p1)
}
  0x22   :  { %34 = dma.hbm_to_vmem [thread:$0]  %s445_s1, 1024, %s29_s27, [#allocation7], %s370_s22, %s370_s22, %s371_s23  }
  0x23   :  { %363 = dma.done.wait [#allocation4], 128  }
  0x24   :  { %364 = vsyncadd [#allocation4], 4294967168 }
  0x25   :  { %365 = dma.done.wait [#allocation7], 1024  }
  0x26   :  { %366 = vsyncadd [#allocation7], 4294966272  ;;  %v373_v0 = vmov 0.0   ;;  %vm374_vm0 = vmmov 0   ;;  %v284_v1 = vld [vmem:[#allocation6] sm:$0xff]   ;;  %v285_v2 = vld [vmem:[#allocation6 + $0x8] sm:$0xff]  }
  0x27   :  { %257 = vmatprep.subr.bf16.mxu0 %v373_v0  ;;  %273 = vmatprep.mubr.msk.bf16.mxu0 %vm374_vm0, %v373_v0  ;;  %v286_v3 = vld [vmem:[#allocation6 + $0x10] sm:$0xff]   ;;  %v287_v4 = vld [vmem:[#allocation6 + $0x18] sm:$0xff]   ;;  %v288_v5 = vld [vmem:[#allocation6 + $0x20] sm:$0xff]  }
  0x28   :  { %258 = vmatpush3.bf16.msra.mxu0 %v284_v1  ;;  %v289_v6 = vld [vmem:[#allocation6 + $0x28] sm:$0xff]   ;;  %v290_v7 = vld [vmem:[#allocation6 + $0x30] sm:$0xff]   ;;  %v291_v8 = vld [vmem:[#allocation6 + $0x38] sm:$0xff]  }
  0x29   :  { %259 = vmatprep.subr.bf16.mxu0 %v373_v0  ;;  %v292_v9 = vld [vmem:[#allocation3] sm:$0xff]  }
  0x2a   :  { %v238_v10 = vld [vmem:[%s446_s2] ss:$0 sm:$0xff]  ;;  %s375_s2 = smov [#allocation8]  }
  0x2b   :  { %s216_s11 = sshll.u32 %s375_s2, 4  ;;  %s217_s11 = int_to_ptr.vmem [resolvable:$true] %s216_s11 }
  0x2c   :  { %260 = vmatpush3.bf16.msra.mxu0 %v285_v2  ;;  %s341_s12 = scalar_lea.vmem %s217_s11, 128  ;;  %p346_p3 = scmp.lt.s32.totalorder %s217_s11, %s217_s11 }
  0x2d   :  { %261 = vmatprep.subr.bf16.mxu0 %v373_v0  ;;  %p342_p2 = scmp.ne.s32.totalorder %s217_s11, %s341_s12  ;;  %p347_p4 = scmp.lt.s32.totalorder %s341_s12, %s341_s12 }
  0x2f   :  { %p348_p5 = por %p347_p4, %p346_p3 }
  0x30   :  { %262 = vmatpush3.bf16.msra.mxu0 %v286_v3 }
  0x31   :  { %263 = vmatprep.subr.bf16.mxu0 %v373_v0  ;;  %p349_p6 = pnand %p348_p5, %p342_p2 }
  0x34   :  { %264 = vmatpush3.bf16.msra.mxu0 %v287_v4 }
  0x35   :  { %265 = vmatprep.subr.bf16.mxu0 %v373_v0 }
  0x38   :  { %266 = vmatpush3.bf16.msra.mxu0 %v288_v5 }
  0x39   :  { %267 = vmatprep.subr.bf16.mxu0 %v373_v0 }
  0x3c   :  { %268 = vmatpush3.bf16.msra.mxu0 %v289_v6 }
  0x3d   :  { %269 = vmatprep.subr.bf16.mxu0 %v373_v0 }
  0x40   :  { %270 = vmatpush3.bf16.msra.mxu0 %v290_v7 }
  0x41   :  { %271 = vmatprep.subr.bf16.mxu0 %v373_v0 }
  0x44   :  { %272 = vmatpush3.bf16.msra.mxu0 %v291_v8 }
  0x47   :  { %274 = vmatmul.mubr.bf16.vlgmr.msra.gmra.mrb[0].mxu0 %v292_v9 }
 0x11a   :  { %v158_v11 = vpop.f32.mrb[0].mxu0 }
 0x11b   :  { %v181_v12 = vadd.f32 %v238_v10, %v158_v11  ;;  %v275_v13 = vpop.f32.mrb[1].mxu0 }
 0x11c   :  { %v161_v14 = vpop.f32.mrb[2].mxu0 }
 0x11d   :  { %v185_v15 = vmul.f32 0.044715, %v181_v12  ;;  %v182_v16 = vadd.f32 %v238_v10, %v161_v14  ;;  %v276_v17 = vpop.f32.mrb[3].mxu0  ;;  %v183_v30 = vmul.f32 0.5, %v181_v12 }
 0x11f   :  { %v187_v18 = vmul.f32 %v185_v15, %v181_v12  ;;  %v186_v19 = vmul.f32 0.044715, %v182_v16  ;;  %v184_v31 = vmul.f32 0.5, %v182_v16 }
 0x121   :  { %v189_v20 = vmul.f32 %v187_v18, %v181_v12  ;;  %v188_v21 = vmul.f32 %v186_v19, %v182_v16 }
 0x123   :  { %v190_v22 = vmul.f32 %v188_v21, %v182_v16  ;;  %v191_v23 = vadd.f32 %v189_v20, %v181_v12 }
 0x125   :  { %v192_v24 = vadd.f32 %v190_v22, %v182_v16  ;;  %v193_v25 = vmul.f32 0.7978846, %v191_v23 }
 0x127   :  { %v194_v26 = vmul.f32 0.7978846, %v192_v24  ;;  %293 = vtanh.f32 %v193_v25 }
 0x129   :  { %295 = vtanh.f32 %v194_v26 }
 0x131   :  { %v294_v27 = vpop.eup %293 }
 0x132   :  { %v197_v28 = vadd.f32 1.0, %v294_v27 }
 0x133   :  { %v296_v29 = vpop.eup %295 }
 0x134   :  { %v198_v32 = vadd.f32 1.0, %v296_v29  ;;  %v199_v33 = vmul.f32 %v197_v28, %v183_v30 }
 0x136   :  { %v200_v34 = vmul.f32 %v198_v32, %v184_v31 }
 0x138   :  { %v246_v35 = vpack.c.bf16 %v200_v34, %v199_v33 }
 0x13a   :  { %247 = vst [vmem:[#allocation8] sm:$0xff] %v246_v35  }
 0x13b   :  { %352 = shalt.err (!%p349_p6)
}
 0x13c   :  { %s353_s15 = scalar_lea.hbm %s447_s3, 128 }
 0x13d   :  { %p354_p7 = scmp.ne.s32.totalorder %s447_s3, %s353_s15  ;;  %p357_p8 = scmp.lt.u32.totalorder %s353_s15, %s447_s3 }
 0x13f   :  { %p359_p9 = pnand %p357_p8, %p354_p7 }
 0x141   :  { %362 = shalt.err (!%p359_p9)
}
 0x142   :  { %222 = dma.vmem_to_hbm [thread:$0]  %s217_s11, 128, %s447_s3, [#allocation5], %s370_s22, %s370_s22, %s371_s23  }
 0x143   :  { %367 = dma.done.wait [#allocation5], 128  }
 0x144   :  { %368 = vsyncadd [#allocation5], 4294967168 }
 0x145   :  { %226 = vsyncpa [#allocation4], 1 }
 0x146   :  { %227 = vsyncpa [#allocation7], 1 }
 0x147   :  { %228 = vsyncpa [#allocation5], 1 }

</bundles_post_ra>
